<compile_context>
chip_gen: v5e
topology: v5e:2x2
jax: 0.10.0
libtpu: 0.0.40
codegen_flags: <defaults>
</compile_context>

<pallas_src>
import math

import jax
import jax.numpy as jnp
from jax.experimental import pallas as pl
from jax.experimental.pallas import tpu as pltpu


def _round_up(x, m):
    return ((x + m - 1) // m) * m


# ----------------------------------------------------------------------------
# Weight preparation (do once, outside the forward path).
# ----------------------------------------------------------------------------
def prepare_weight(w_oc_ic, dtype=jnp.float32):
    """Pack Conv2d(dim*4, dim, 1, bias=False) weight for the fused kernel.

    w_oc_ic: (n_out, 4*C) -- the squeezed PyTorch conv weight, where the input
             channel index is c*4 + p1*2 + p2 (einops '(c p1 p2)' order).
    Returns (w_packed, n_out) with w_packed of shape (4, C, N_pad), N_pad a
    multiple of 128, cast to `dtype` (match the activation dtype).
    """
    n_out, k = w_oc_ic.shape
    assert k % 4 == 0
    c = k // 4
    w = w_oc_ic.reshape(n_out, c, 2, 2)            # [o, c, p1, p2]
    w = jnp.transpose(w, (2, 3, 1, 0))             # [p1, p2, c, o]
    w = w.reshape(4, c, n_out)                     # [(p1*2+p2), c, o]
    n_pad = _round_up(n_out, 128)
    if n_pad != n_out:
        w = jnp.pad(w, ((0, 0), (0, 0), (0, n_pad - n_out)))
    return w.astype(dtype), n_out


# ----------------------------------------------------------------------------
# Fused pixel-unshuffle + 1x1-conv GEMM kernel.
# ----------------------------------------------------------------------------
def _fused_unshuffle_conv_kernel(x00_ref, x01_ref, x10_ref, x11_ref, w_ref, o_ref):
    # x??_ref: (TM, C), w_ref: (4, C, Np), o_ref: (TM, Np)
    acc = jnp.dot(x00_ref[...], w_ref[0], preferred_element_type=jnp.float32)
    acc = acc + jnp.dot(x01_ref[...], w_ref[1], preferred_element_type=jnp.float32)
    acc = acc + jnp.dot(x10_ref[...], w_ref[2], preferred_element_type=jnp.float32)
    acc = acc + jnp.dot(x11_ref[...], w_ref[3], preferred_element_type=jnp.float32)
    o_ref[...] = acc.astype(o_ref.dtype)


def _pick_tm(c, n_pad, in_bytes, out_bytes, budget_bytes=24 * 1024 * 1024):
    """Largest TM in {1024, 512, ..., 8} whose double-buffered footprint fits."""
    w_bytes = 2 * 4 * c * n_pad * in_bytes  # weight (conservatively double-buffered)
    tm = 1024
    while tm > 8:
        step = 2 * (4 * tm * c * in_bytes + tm * n_pad * out_bytes)
        if step + w_bytes <= budget_bytes:
            break
        tm //= 2
    return max(8, tm)


def _fused_conv1x1(views, w_packed, out_dtype, block_m=None):
    """views: four (M, C) arrays (p1,p2 phases); w_packed: (4, C, Np).

    Returns (M_pad, Np) output; caller slices [:M, :n_out].
    """
    m, c = views[0].shape
    _, c_w, n_pad = w_packed.shape
    assert c_w == c and n_pad % 128 == 0
    w_packed = w_packed.astype(out_dtype)  # no-op when pre-cast via prepare_weight

    in_bytes = jnp.dtype(views[0].dtype).itemsize
    out_bytes = jnp.dtype(out_dtype).itemsize
    if block_m is not None:
        tm = max(8, _round_up(int(block_m), 8))
    else:
        tm = _pick_tm(c, n_pad, in_bytes, out_bytes)
    tm = min(tm, _round_up(m, 8))
    m_pad = _round_up(m, tm)
    if m_pad != m:
        views = [jnp.pad(v, ((0, m_pad - m), (0, 0))) for v in views]

    grid = (m_pad // tm,)
    flops = 2 * m_pad * (4 * c) * n_pad
    bytes_accessed = (4 * m_pad * c + 4 * c * n_pad) * in_bytes + m_pad * n_pad * out_bytes

    x_spec = pl.BlockSpec((tm, c), lambda i: (i, 0))
    w_spec = pl.BlockSpec((4, c, n_pad), lambda i: (0, 0, 0))  # resident weight
    o_spec = pl.BlockSpec((tm, n_pad), lambda i: (i, 0))

    return pl.pallas_call(
        _fused_unshuffle_conv_kernel,
        out_shape=jax.ShapeDtypeStruct((m_pad, n_pad), out_dtype),
        grid_spec=pltpu.PrefetchScalarGridSpec(
            num_scalar_prefetch=0,
            grid=grid,
            in_specs=[x_spec, x_spec, x_spec, x_spec, w_spec],
            out_specs=o_spec,
        ),
        compiler_params=pltpu.CompilerParams(
            dimension_semantics=("parallel",),
            vmem_limit_bytes=32 * 1024 * 1024,
        ),
        cost_estimate=pl.CostEstimate(
            flops=flops, transcendentals=0, bytes_accessed=bytes_accessed
        ),
    )(*views, w_packed)


# ----------------------------------------------------------------------------
# Layout wrappers.
# ----------------------------------------------------------------------------
def downsample_space_nhwc(x_nhwc, w_packed, n_out, block_m=None):
    """Channels-last fast path: (B, H, W, C) -> (B, H/2, W/2, n_out)."""
    b, h, w, c = x_nhwc.shape
    assert h % 2 == 0 and w % 2 == 0
    ho, wo = h // 2, w // 2
    m = b * ho * wo
    views = [
        x_nhwc[:, p1::2, p2::2, :].reshape(m, c)
        for p1 in (0, 1) for p2 in (0, 1)
    ]
    out2d = _fused_conv1x1(views, w_packed, x_nhwc.dtype, block_m=block_m)
    return out2d[:m, :n_out].reshape(b, ho, wo, n_out)


def downsample_space_nchw(x_nchw, w_packed, n_out, block_m=None):
    """PyTorch-layout path: (B, C, H, W) -> (B, n_out, H/2, W/2)."""
    b, c, h, w = x_nchw.shape
    assert h % 2 == 0 and w % 2 == 0
    ho, wo = h // 2, w // 2
    m = b * ho * wo
    # Slice first (quarter-size each), then NCHW->NHWC per view; XLA fuses the
    # strided slice + transpose into a single copy per view.
    views = [
        jnp.transpose(x_nchw[:, :, p1::2, p2::2], (0, 2, 3, 1)).reshape(m, c)
        for p1 in (0, 1) for p2 in (0, 1)
    ]
    out2d = _fused_conv1x1(views, w_packed, x_nchw.dtype, block_m=block_m)
    y = out2d[:m, :n_out].reshape(b, ho, wo, n_out)
    return jnp.transpose(y, (0, 3, 1, 2))


def downsample_forward(x, w_packed, n_out, enable_time=True):
    """Forward of Downsample(dim) with default flags (PyTorch axis order).

    x: (B, C, H, W) image or (B, C, F, H, W) video.
    w_packed, n_out: output of prepare_weight().
    """
    is_video = x.ndim == 5
    if is_video:
        b, c, f_, h, w = x.shape
        # 'b c f h w -> (b f) h w c' in a single transpose, run spatial
        # downsample per frame in channels-last, then restore 'b c f h w'.
        x_nhwc = jnp.transpose(x, (0, 2, 3, 4, 1)).reshape(b * f_, h, w, c)
        y = downsample_space_nhwc(x_nhwc, w_packed, n_out)
        y = y.reshape(b, f_, h // 2, w // 2, n_out)
        y = jnp.transpose(y, (0, 4, 1, 2, 3))
        # down_time is None with default constructor args, so return here
        # regardless of enable_time.
        return y
    return downsample_space_nchw(x, w_packed, n_out)


# ----------------------------------------------------------------------------
# Pure-JAX reference (mirrors the PyTorch module) for the self-test.
# ----------------------------------------------------------------------------
def _ref_downsample_image(x_nchw, w_oc_ic):
    b, c, h, w = x_nchw.shape
    xr = x_nchw.reshape(b, c, h // 2, 2, w // 2, 2)
    xr = jnp.transpose(xr, (0, 1, 3, 5, 2, 4)).reshape(b, 4 * c, h // 2, w // 2)
    return jnp.einsum("ok,bkhw->bohw", w_oc_ic, xr)


if __name__ == "__main__":
    key = jax.random.PRNGKey(0)
    k_x, k_w, k_v = jax.random.split(key, 3)

    dim = 4
    B, H, W, F_ = 2, 16, 16, 4

    x = jax.random.normal(k_x, (B, dim, H, W), dtype=jnp.float32)

    # Conv2d(dim*4, dim, 1, bias=False) weight: (dim, dim*4, 1, 1) squeezed.
    fan_in = dim * 4
    bound = 1.0 / math.sqrt(fan_in)
    w = jax.random.uniform(
        k_w, (dim, dim * 4), minval=-bound, maxval=bound, dtype=jnp.float32
    )

    # Pack / pad / cast the weight once, outside the forward path.
    w_packed, n_out = prepare_weight(w, dtype=x.dtype)

    # Image path.
    y = jax.block_until_ready(downsample_forward(x, w_packed, n_out))
    assert y.shape == (B, dim, H // 2, W // 2), y.shape
    y_ref = _ref_downsample_image(x, w)
    assert jnp.allclose(y, y_ref, atol=1e-4, rtol=1e-4), float(
        jnp.max(jnp.abs(y - y_ref))
    )

    # Video path (frames folded into batch; down_time is None by default).
    xv = jax.random.normal(k_v, (B, dim, F_, H, W), dtype=jnp.float32)
    yv = jax.block_until_ready(downsample_forward(xv, w_packed, n_out))
    assert yv.shape == (B, dim, F_, H // 2, W // 2), yv.shape
    yv_ref = jnp.stack(
        [_ref_downsample_image(xv[:, :, f], w) for f in range(F_)], axis=2
    )
    assert jnp.allclose(yv, yv_ref, atol=1e-4, rtol=1e-4)

    # Exercise the multi-block + row-padded grid path explicitly.
    y2 = jax.block_until_ready(downsample_space_nchw(x, w_packed, n_out, block_m=48))
    assert jnp.allclose(y2, y_ref, atol=1e-4, rtol=1e-4)

    print("KERNEL_OK")
</pallas_src>

<mosaic_0001>
module attributes {stable_mosaic.version = 11 : i64} {
  func.func @_fused_unshuffle_conv_kernel(%arg0: i32, %arg1: memref<128x4xf32, #tpu.memory_space<vmem>>, %arg2: memref<128x4xf32, #tpu.memory_space<vmem>>, %arg3: memref<128x4xf32, #tpu.memory_space<vmem>>, %arg4: memref<128x4xf32, #tpu.memory_space<vmem>>, %arg5: memref<4x4x128xf32, #tpu.memory_space<vmem>>, %arg6: memref<128x128xf32, #tpu.memory_space<vmem>>) attributes {dimension_semantics = [#tpu.dimension_semantics<parallel>], iteration_bounds = array<i64: 1>, scalar_prefetch = 0 : i64, scratch_operands = 0 : i64, tpu.core_type = #tpu.core_type<tc>, window_params = [{transform_indices = @transform_0, window_bounds = array<i64: 128, 4>}, {transform_indices = @transform_1, window_bounds = array<i64: 128, 4>}, {transform_indices = @transform_2, window_bounds = array<i64: 128, 4>}, {transform_indices = @transform_3, window_bounds = array<i64: 128, 4>}, {pipeline_mode = #tpu.pipeline_mode<synchronous>, transform_indices = @transform_4, window_bounds = array<i64: 4, 4, 128>}, {transform_indices = @transform_5, window_bounds = array<i64: 128, 128>}]} {
    %c0 = arith.constant 0 : index
    %c0_0 = arith.constant 0 : index
    %0 = vector.load %arg1[%c0, %c0_0] : memref<128x4xf32, #tpu.memory_space<vmem>>, vector<128x4xf32>
    %c0_1 = arith.constant 0 : index
    %c0_2 = arith.constant 0 : index
    %c0_3 = arith.constant 0 : index
    %1 = vector.load %arg5[%c0_1, %c0_2, %c0_3] : memref<4x4x128xf32, #tpu.memory_space<vmem>>, vector<1x4x128xf32>
    %2 = vector.shape_cast %1 : vector<1x4x128xf32> to vector<4x128xf32>
    %cst = arith.constant dense<0.000000e+00> : vector<128x128xf32>
    %3 = tpu.matmul %0, %2, %cst {dimension_numbers = #tpu.dot_dimension_numbers<[1], [0], [0], [1], [0, 0, 1, 1], [], []>} : vector<128x4xf32>, vector<4x128xf32>, vector<128x128xf32> -> vector<128x128xf32>
    %c0_4 = arith.constant 0 : index
    %c0_5 = arith.constant 0 : index
    %4 = vector.load %arg2[%c0_4, %c0_5] : memref<128x4xf32, #tpu.memory_space<vmem>>, vector<128x4xf32>
    %c1 = arith.constant 1 : index
    %c0_6 = arith.constant 0 : index
    %c0_7 = arith.constant 0 : index
    %5 = vector.load %arg5[%c1, %c0_6, %c0_7] : memref<4x4x128xf32, #tpu.memory_space<vmem>>, vector<1x4x128xf32>
    %6 = vector.shape_cast %5 : vector<1x4x128xf32> to vector<4x128xf32>
    %cst_8 = arith.constant dense<0.000000e+00> : vector<128x128xf32>
    %7 = tpu.matmul %4, %6, %cst_8 {dimension_numbers = #tpu.dot_dimension_numbers<[1], [0], [0], [1], [0, 0, 1, 1], [], []>} : vector<128x4xf32>, vector<4x128xf32>, vector<128x128xf32> -> vector<128x128xf32>
    %8 = arith.addf %3, %7 : vector<128x128xf32>
    %c0_9 = arith.constant 0 : index
    %c0_10 = arith.constant 0 : index
    %9 = vector.load %arg3[%c0_9, %c0_10] : memref<128x4xf32, #tpu.memory_space<vmem>>, vector<128x4xf32>
    %c2 = arith.constant 2 : index
    %c0_11 = arith.constant 0 : index
    %c0_12 = arith.constant 0 : index
    %10 = vector.load %arg5[%c2, %c0_11, %c0_12] : memref<4x4x128xf32, #tpu.memory_space<vmem>>, vector<1x4x128xf32>
    %11 = vector.shape_cast %10 : vector<1x4x128xf32> to vector<4x128xf32>
    %cst_13 = arith.constant dense<0.000000e+00> : vector<128x128xf32>
    %12 = tpu.matmul %9, %11, %cst_13 {dimension_numbers = #tpu.dot_dimension_numbers<[1], [0], [0], [1], [0, 0, 1, 1], [], []>} : vector<128x4xf32>, vector<4x128xf32>, vector<128x128xf32> -> vector<128x128xf32>
    %13 = arith.addf %8, %12 : vector<128x128xf32>
    %c0_14 = arith.constant 0 : index
    %c0_15 = arith.constant 0 : index
    %14 = vector.load %arg4[%c0_14, %c0_15] : memref<128x4xf32, #tpu.memory_space<vmem>>, vector<128x4xf32>
    %c3 = arith.constant 3 : index
    %c0_16 = arith.constant 0 : index
    %c0_17 = arith.constant 0 : index
    %15 = vector.load %arg5[%c3, %c0_16, %c0_17] : memref<4x4x128xf32, #tpu.memory_space<vmem>>, vector<1x4x128xf32>
    %16 = vector.shape_cast %15 : vector<1x4x128xf32> to vector<4x128xf32>
    %cst_18 = arith.constant dense<0.000000e+00> : vector<128x128xf32>
    %17 = tpu.matmul %14, %16, %cst_18 {dimension_numbers = #tpu.dot_dimension_numbers<[1], [0], [0], [1], [0, 0, 1, 1], [], []>} : vector<128x4xf32>, vector<4x128xf32>, vector<128x128xf32> -> vector<128x128xf32>
    %18 = arith.addf %13, %17 : vector<128x128xf32>
    %c0_19 = arith.constant 0 : index
    %c0_20 = arith.constant 0 : index
    %19 = vector.load %arg6[%c0_19, %c0_20] : memref<128x128xf32, #tpu.memory_space<vmem>>, vector<128x128xf32>
    tpu.vector_store %arg6[%c0_19, %c0_20], %18 {strides = array<i32>} : memref<128x128xf32, #tpu.memory_space<vmem>>, vector<128x128xf32>,
    return
  }
  func.func @transform_0(%arg0: i32) -> (i32, i32) {
    %c0_i32 = arith.constant 0 : i32
    %c0_i32_0 = arith.constant 0 : i32
    return %arg0, %c0_i32 : i32, i32
  }
  func.func @transform_1(%arg0: i32) -> (i32, i32) {
    %c0_i32 = arith.constant 0 : i32
    %c0_i32_0 = arith.constant 0 : i32
    return %arg0, %c0_i32 : i32, i32
  }
  func.func @transform_2(%arg0: i32) -> (i32, i32) {
    %c0_i32 = arith.constant 0 : i32
    %c0_i32_0 = arith.constant 0 : i32
    return %arg0, %c0_i32 : i32, i32
  }
  func.func @transform_3(%arg0: i32) -> (i32, i32) {
    %c0_i32 = arith.constant 0 : i32
    %c0_i32_0 = arith.constant 0 : i32
    return %arg0, %c0_i32 : i32, i32
  }
  func.func @transform_4(%arg0: i32) -> (i32, i32, i32) {
    %c0_i32 = arith.constant 0 : i32
    %c0_i32_0 = arith.constant 0 : i32
    %c0_i32_1 = arith.constant 0 : i32
    %c0_i32_2 = arith.constant 0 : i32
    return %c0_i32, %c0_i32_0, %c0_i32_1 : i32, i32, i32
  }
  func.func @transform_5(%arg0: i32) -> (i32, i32) {
    %c0_i32 = arith.constant 0 : i32
    %c0_i32_0 = arith.constant 0 : i32
    return %arg0, %c0_i32 : i32, i32
  }
}

</mosaic_0001>

<bundles_post_ra>
// kernel: tpu_custom_call.1
= control target key start
LH: loop header
LB: loop body
LE: loop exit
PB: predicated region body
PF: predicated region fallthrough
CT: control target
= control target key end

     0   :  { %vm105_vm0 = vcmask 1043456   ;;  %vm56_vm1 = vcmask 31744   ;;  %s1028_s0 = inlined_call_operand.vmem [shape: f32[128,4], index: 0, kind: input, shape index: {}]   ;;  %s1029_s1 = inlined_call_operand.vmem [shape: f32[128,4], index: 1, kind: input, shape index: {}]   ;;  %s1030_s2 = inlined_call_operand.vmem [shape: f32[128,4], index: 2, kind: input, shape index: {}]   ;;  %s1031_s3 = inlined_call_operand.vmem [shape: f32[128,4], index: 3, kind: input, shape index: {}]   ;;  %s1032_s4 = inlined_call_operand.vmem [shape: f32[4,4,128], index: 4, kind: input, shape index: {}]   ;;  %s1033_s5 = inlined_call_operand.hbm [shape: f32[128,128], index: 5, kind: output, shape index: {}]  }
   0x1   :  { %v659_v0 = vld [vmem:[%s1032_s4 + $0x8] sm:$0xf]  ;;  %v290_v1 = vld [vmem:[%s1030_s2] sm:$0xff]  ;;  %v677_v3 = vld [vmem:[%s1032_s4 + $0xc] sm:$0xf] }
   0x2   :  { %v440_v2 = vld [vmem:[%s1031_s3] sm:$0xff]  ;;  %660 = vmatpush.msk.msra.mxu2 %vm105_vm0, %v659_v0  ;;  %678 = vmatpush.msk.msra.mxu3 %vm105_vm0, %v677_v3  ;;  %v291_v8 = vld [vmem:[%s1030_s2 + $0x8] sm:$0xff] }
   0x3   :  { %v624_v4 = vld [vmem:[%s1032_s4 + $0x4] sm:$0xf]  ;;  %v37_v5 = vld [vmem:[%s1032_s4] sm:$0xf]  ;;  %661 = vmatmul.msk.f32.vlgmr.msra.gmra.mxu2 %vm56_vm1, %v290_v1  ;;  %679 = vmatmul.msk.f32.vlgmr.msra.gmra.mxu3 %vm56_vm1, %v440_v2  ;;  %v441_v9 = vld [vmem:[%s1031_s3 + $0x8] sm:$0xff] }
   0x4   :  { %v38_v6 = vld [vmem:[%s1029_s1] sm:$0xff]  ;;  %625 = vmatpush.msk.msra.mxu0 %vm105_vm0, %v624_v4  ;;  %642 = vmatpush.msk.msra.mxu1 %vm105_vm0, %v37_v5 }
   0x5   :  { %v21_v7 = vld [vmem:[%s1028_s0] sm:$0xff]  ;;  %626 = vmatmul.msk.f32.vlgmr.msra.gmra.mxu0 %vm56_vm1, %v38_v6 }
   0x6   :  { %643 = vmatmul.msk.f32.vlgmr.msra.gmra.mxu1 %vm56_vm1, %v21_v7 }
   0x7   :  { %10 = vsyncpa [#allocation3], 0  ;;  %v39_v10 = vld [vmem:[%s1029_s1 + $0x8] sm:$0xff]  ;;  %v292_v12 = vld [vmem:[%s1030_s2 + $0x10] sm:$0xff]  ;;  %s612_s24 = sshll.u32 %s1033_s5, 4  ;;  %s725_s25 = smov 128   ;;  %s613_s24 = int_to_ptr.hbm [resolvable:$true] %s612_s24 }
   0x8   :  { %v22_v11 = vld [vmem:[%s1028_s0 + $0x8] sm:$0xff]  ;;  %v442_v13 = vld [vmem:[%s1031_s3 + $0x10] sm:$0xff]  ;;  %v293_v16 = vld [vmem:[%s1030_s2 + $0x18] sm:$0xff]  ;;  %s726_s26 = smov 8  }
   0x9   :  { %v40_v14 = vld [vmem:[%s1029_s1 + $0x10] sm:$0xff]  ;;  %v443_v17 = vld [vmem:[%s1031_s3 + $0x18] sm:$0xff]  ;;  %v294_v20 = vld [vmem:[%s1030_s2 + $0x20] sm:$0xff] }
   0xa   :  { %v23_v15 = vld [vmem:[%s1028_s0 + $0x10] sm:$0xff]  ;;  %v41_v18 = vld [vmem:[%s1029_s1 + $0x18] sm:$0xff]  ;;  %v444_v21 = vld [vmem:[%s1031_s3 + $0x20] sm:$0xff] }
   0xb   :  { %662 = vmatmul.msk.f32.gmra.mxu2 %vm56_vm1, %v291_v8  ;;  %680 = vmatmul.msk.f32.gmra.mxu3 %vm56_vm1, %v441_v9  ;;  %v24_v19 = vld [vmem:[%s1028_s0 + $0x18] sm:$0xff]  ;;  %v42_v22 = vld [vmem:[%s1029_s1 + $0x20] sm:$0xff]  ;;  %v295_v24 = vld [vmem:[%s1030_s2 + $0x28] sm:$0xff] }
   0xc   :  { %v25_v23 = vld [vmem:[%s1028_s0 + $0x20] sm:$0xff]  ;;  %v445_v25 = vld [vmem:[%s1031_s3 + $0x28] sm:$0xff]  ;;  %v296_v28 = vld [vmem:[%s1030_s2 + $0x30] sm:$0xff] }
   0xd   :  { %627 = vmatmul.msk.f32.gmra.mxu0 %vm56_vm1, %v39_v10  ;;  %v43_v26 = vld [vmem:[%s1029_s1 + $0x28] sm:$0xff]  ;;  %v446_v29 = vld [vmem:[%s1031_s3 + $0x30] sm:$0xff]  ;;  %v297_v32 = vld [vmem:[%s1030_s2 + $0x38] sm:$0xff] }
   0xe   :  { %644 = vmatmul.msk.f32.gmra.mxu1 %vm56_vm1, %v22_v11  ;;  %v26_v27 = vld [vmem:[%s1028_s0 + $0x28] sm:$0xff]  ;;  %v44_v30 = vld [vmem:[%s1029_s1 + $0x30] sm:$0xff]  ;;  %v447_v33 = vld [vmem:[%s1031_s3 + $0x38] sm:$0xff] }
   0xf   :  { %v27_v31 = vld [vmem:[%s1028_s0 + $0x30] sm:$0xff]  ;;  %v45_v34 = vld [vmem:[%s1029_s1 + $0x38] sm:$0xff]  ;;  %v298_v36 = vld [vmem:[%s1030_s2 + $0x40] sm:$0xff] }
  0x10   :  { %v28_v35 = vld [vmem:[%s1028_s0 + $0x38] sm:$0xff]  ;;  %v448_v37 = vld [vmem:[%s1031_s3 + $0x40] sm:$0xff]  ;;  %v299_v40 = vld [vmem:[%s1030_s2 + $0x48] sm:$0xff] }
  0x11   :  { %v46_v38 = vld [vmem:[%s1029_s1 + $0x40] sm:$0xff]  ;;  %v449_v41 = vld [vmem:[%s1031_s3 + $0x48] sm:$0xff]  ;;  %v300_v44 = vld [vmem:[%s1030_s2 + $0x50] sm:$0xff] }
  0x12   :  { %v29_v39 = vld [vmem:[%s1028_s0 + $0x40] sm:$0xff]  ;;  %v47_v42 = vld [vmem:[%s1029_s1 + $0x48] sm:$0xff]  ;;  %v450_v45 = vld [vmem:[%s1031_s3 + $0x50] sm:$0xff] }
  0x13   :  { %663 = vmatmul.msk.f32.gmra.mxu2 %vm56_vm1, %v292_v12  ;;  %681 = vmatmul.msk.f32.gmra.mxu3 %vm56_vm1, %v442_v13  ;;  %v30_v43 = vld [vmem:[%s1028_s0 + $0x48] sm:$0xff]  ;;  %v48_v46 = vld [vmem:[%s1029_s1 + $0x50] sm:$0xff]  ;;  %v301_v48 = vld [vmem:[%s1030_s2 + $0x58] sm:$0xff] }
  0x14   :  { %v31_v47 = vld [vmem:[%s1028_s0 + $0x50] sm:$0xff]  ;;  %v451_v49 = vld [vmem:[%s1031_s3 + $0x58] sm:$0xff]  ;;  %v302_v52 = vld [vmem:[%s1030_s2 + $0x60] sm:$0xff] }
  0x15   :  { %628 = vmatmul.msk.f32.gmra.mxu0 %vm56_vm1, %v40_v14  ;;  %v49_v50 = vld [vmem:[%s1029_s1 + $0x58] sm:$0xff]  ;;  %v452_v53 = vld [vmem:[%s1031_s3 + $0x60] sm:$0xff]  ;;  %v303_v56 = vld [vmem:[%s1030_s2 + $0x68] sm:$0xff] }
  0x16   :  { %645 = vmatmul.msk.f32.gmra.mxu1 %vm56_vm1, %v23_v15  ;;  %v32_v51 = vld [vmem:[%s1028_s0 + $0x58] sm:$0xff]  ;;  %v50_v54 = vld [vmem:[%s1029_s1 + $0x60] sm:$0xff]  ;;  %v453_v57 = vld [vmem:[%s1031_s3 + $0x68] sm:$0xff] }
  0x17   :  { %v33_v55 = vld [vmem:[%s1028_s0 + $0x60] sm:$0xff]  ;;  %v51_v58 = vld [vmem:[%s1029_s1 + $0x68] sm:$0xff]  ;;  %v304_v60 = vld [vmem:[%s1030_s2 + $0x70] sm:$0xff] }
  0x18   :  { %v34_v59 = vld [vmem:[%s1028_s0 + $0x68] sm:$0xff]  ;;  %v454_v61 = vld [vmem:[%s1031_s3 + $0x70] sm:$0xff]  ;;  %v305_v0 = vld [vmem:[%s1030_s2 + $0x78] sm:$0xff] }
  0x19   :  { %v52_v62 = vld [vmem:[%s1029_s1 + $0x70] sm:$0xff]  ;;  %v455_v1 = vld [vmem:[%s1031_s3 + $0x78] sm:$0xff] }
  0x1a   :  { %v35_v63 = vld [vmem:[%s1028_s0 + $0x70] sm:$0xff]  ;;  %v53_v2 = vld [vmem:[%s1029_s1 + $0x78] sm:$0xff] }
  0x1b   :  { %664 = vmatmul.msk.f32.gmra.mxu2 %vm56_vm1, %v293_v16  ;;  %682 = vmatmul.msk.f32.gmra.mxu3 %vm56_vm1, %v443_v17  ;;  %v36_v3 = vld [vmem:[%s1028_s0 + $0x78] sm:$0xff]  ;;  %s724_s0 = smov [#allocation2]  }
  0x1c   :  { %s610_s1 = sshll.u32 %s724_s0, 4  ;;  %s611_s1 = int_to_ptr.vmem [resolvable:$true] %s610_s1 }
  0x1d   :  { %629 = vmatmul.msk.f32.gmra.mxu0 %vm56_vm1, %v41_v18 }
  0x1e   :  { %646 = vmatmul.msk.f32.gmra.mxu1 %vm56_vm1, %v24_v19 }
  0x23   :  { %665 = vmatmul.msk.f32.gmra.mxu2 %vm56_vm1, %v294_v20  ;;  %683 = vmatmul.msk.f32.gmra.mxu3 %vm56_vm1, %v444_v21 }
  0x25   :  { %630 = vmatmul.msk.f32.gmra.mxu0 %vm56_vm1, %v42_v22 }
  0x26   :  { %647 = vmatmul.msk.f32.gmra.mxu1 %vm56_vm1, %v25_v23 }
  0x2b   :  { %666 = vmatmul.msk.f32.gmra.mxu2 %vm56_vm1, %v295_v24  ;;  %684 = vmatmul.msk.f32.gmra.mxu3 %vm56_vm1, %v445_v25 }
  0x2d   :  { %631 = vmatmul.msk.f32.gmra.mxu0 %vm56_vm1, %v43_v26 }
  0x2e   :  { %648 = vmatmul.msk.f32.gmra.mxu1 %vm56_vm1, %v26_v27 }
  0x33   :  { %667 = vmatmul.msk.f32.gmra.mxu2 %vm56_vm1, %v296_v28  ;;  %685 = vmatmul.msk.f32.gmra.mxu3 %vm56_vm1, %v446_v29 }
  0x35   :  { %632 = vmatmul.msk.f32.gmra.mxu0 %vm56_vm1, %v44_v30 }
  0x36   :  { %649 = vmatmul.msk.f32.gmra.mxu1 %vm56_vm1, %v27_v31 }
  0x3b   :  { %668 = vmatmul.msk.f32.gmra.mxu2 %vm56_vm1, %v297_v32  ;;  %686 = vmatmul.msk.f32.gmra.mxu3 %vm56_vm1, %v447_v33 }
  0x3d   :  { %633 = vmatmul.msk.f32.gmra.mxu0 %vm56_vm1, %v45_v34 }
  0x3e   :  { %650 = vmatmul.msk.f32.gmra.mxu1 %vm56_vm1, %v28_v35 }
  0x43   :  { %669 = vmatmul.msk.f32.gmra.mxu2 %vm56_vm1, %v298_v36  ;;  %687 = vmatmul.msk.f32.gmra.mxu3 %vm56_vm1, %v448_v37 }
  0x45   :  { %634 = vmatmul.msk.f32.gmra.mxu0 %vm56_vm1, %v46_v38 }
  0x46   :  { %651 = vmatmul.msk.f32.gmra.mxu1 %vm56_vm1, %v29_v39 }
  0x4b   :  { %670 = vmatmul.msk.f32.gmra.mxu2 %vm56_vm1, %v299_v40  ;;  %688 = vmatmul.msk.f32.gmra.mxu3 %vm56_vm1, %v449_v41 }
  0x4d   :  { %635 = vmatmul.msk.f32.gmra.mxu0 %vm56_vm1, %v47_v42 }
  0x4e   :  { %652 = vmatmul.msk.f32.gmra.mxu1 %vm56_vm1, %v30_v43 }
  0x53   :  { %671 = vmatmul.msk.f32.gmra.mxu2 %vm56_vm1, %v300_v44  ;;  %689 = vmatmul.msk.f32.gmra.mxu3 %vm56_vm1, %v450_v45 }
  0x55   :  { %636 = vmatmul.msk.f32.gmra.mxu0 %vm56_vm1, %v48_v46 }
  0x56   :  { %653 = vmatmul.msk.f32.gmra.mxu1 %vm56_vm1, %v31_v47 }
  0x5b   :  { %672 = vmatmul.msk.f32.gmra.mxu2 %vm56_vm1, %v301_v48  ;;  %690 = vmatmul.msk.f32.gmra.mxu3 %vm56_vm1, %v451_v49 }
  0x5d   :  { %637 = vmatmul.msk.f32.gmra.mxu0 %vm56_vm1, %v49_v50 }
  0x5e   :  { %654 = vmatmul.msk.f32.gmra.mxu1 %vm56_vm1, %v32_v51 }
  0x63   :  { %673 = vmatmul.msk.f32.gmra.mxu2 %vm56_vm1, %v302_v52  ;;  %691 = vmatmul.msk.f32.gmra.mxu3 %vm56_vm1, %v452_v53 }
  0x65   :  { %638 = vmatmul.msk.f32.gmra.mxu0 %vm56_vm1, %v50_v54 }
  0x66   :  { %655 = vmatmul.msk.f32.gmra.mxu1 %vm56_vm1, %v33_v55 }
  0x6b   :  { %674 = vmatmul.msk.f32.gmra.mxu2 %vm56_vm1, %v303_v56  ;;  %692 = vmatmul.msk.f32.gmra.mxu3 %vm56_vm1, %v453_v57 }
  0x6d   :  { %639 = vmatmul.msk.f32.gmra.mxu0 %vm56_vm1, %v51_v58 }
  0x6e   :  { %656 = vmatmul.msk.f32.gmra.mxu1 %vm56_vm1, %v34_v59 }
  0x73   :  { %675 = vmatmul.msk.f32.gmra.mxu2 %vm56_vm1, %v304_v60  ;;  %693 = vmatmul.msk.f32.gmra.mxu3 %vm56_vm1, %v454_v61 }
  0x75   :  { %640 = vmatmul.msk.f32.gmra.mxu0 %vm56_vm1, %v52_v62 }
  0x76   :  { %657 = vmatmul.msk.f32.gmra.mxu1 %vm56_vm1, %v35_v63 }
  0x7b   :  { %676 = vmatmul.msk.f32.gmra.mxu2 %vm56_vm1, %v305_v0  ;;  %694 = vmatmul.msk.f32.gmra.mxu3 %vm56_vm1, %v455_v1 }
  0x7d   :  { %641 = vmatmul.msk.f32.gmra.mxu0 %vm56_vm1, %v53_v2 }
  0x7e   :  { %658 = vmatmul.msk.f32.gmra.mxu1 %vm56_vm1, %v36_v3 }
  0x82   :  { %v126_v4 = vpop.f32.mrf.mxu0 }
  0x83   :  { %v242_v5 = vpop.f32.mrf.mxu1 }
  0x84   :  { %v243_v6 = vadd.f32 %v242_v5, %v126_v4 }
  0x86   :  { %v376_v7 = vpop.f32.mrf.mxu2  ;;  %v526_v9 = vpop.f32.mrf.mxu3 }
  0x87   :  { %v424_v8 = vadd.f32 %v376_v7, %v243_v6 }
  0x89   :  { %v574_v10 = vadd.f32 %v526_v9, %v424_v8 }
  0x8a   :  { %v129_v11 = vpop.f32.mrf.mxu0 }
  0x8b   :  { %590 = vst [vmem:[#allocation2] sm:$0xff] %v574_v10  ;;  %v245_v12 = vpop.f32.mrf.mxu1 }
  0x8c   :  { %v246_v13 = vadd.f32 %v245_v12, %v129_v11 }
  0x8e   :  { %v379_v14 = vpop.f32.mrf.mxu2  ;;  %v529_v16 = vpop.f32.mrf.mxu3 }
  0x8f   :  { %v425_v15 = vadd.f32 %v379_v14, %v246_v13 }
  0x91   :  { %v575_v17 = vadd.f32 %v529_v16, %v425_v15 }
  0x92   :  { %v132_v18 = vpop.f32.mrf.mxu0 }
  0x93   :  { %591 = vst [vmem:[#allocation2 + $0x8] sm:$0xff] %v575_v17  ;;  %v248_v19 = vpop.f32.mrf.mxu1 }
  0x94   :  { %v249_v20 = vadd.f32 %v248_v19, %v132_v18 }
  0x96   :  { %v382_v21 = vpop.f32.mrf.mxu2  ;;  %v532_v23 = vpop.f32.mrf.mxu3 }
  0x97   :  { %v426_v22 = vadd.f32 %v382_v21, %v249_v20 }
  0x99   :  { %v576_v24 = vadd.f32 %v532_v23, %v426_v22 }
  0x9a   :  { %v135_v25 = vpop.f32.mrf.mxu0 }
  0x9b   :  { %592 = vst [vmem:[#allocation2 + $0x10] sm:$0xff] %v576_v24  ;;  %v251_v26 = vpop.f32.mrf.mxu1 }
  0x9c   :  { %v252_v27 = vadd.f32 %v251_v26, %v135_v25 }
  0x9e   :  { %v385_v28 = vpop.f32.mrf.mxu2  ;;  %v535_v30 = vpop.f32.mrf.mxu3 }
  0x9f   :  { %v427_v29 = vadd.f32 %v385_v28, %v252_v27 }
  0xa1   :  { %v577_v31 = vadd.f32 %v535_v30, %v427_v29 }
  0xa2   :  { %v138_v32 = vpop.f32.mrf.mxu0 }
  0xa3   :  { %593 = vst [vmem:[#allocation2 + $0x18] sm:$0xff] %v577_v31  ;;  %v254_v33 = vpop.f32.mrf.mxu1 }
  0xa4   :  { %v255_v34 = vadd.f32 %v254_v33, %v138_v32 }
  0xa6   :  { %v388_v35 = vpop.f32.mrf.mxu2  ;;  %v538_v37 = vpop.f32.mrf.mxu3 }
  0xa7   :  { %v428_v36 = vadd.f32 %v388_v35, %v255_v34 }
  0xa9   :  { %v578_v38 = vadd.f32 %v538_v37, %v428_v36 }
  0xaa   :  { %v141_v39 = vpop.f32.mrf.mxu0 }
  0xab   :  { %594 = vst [vmem:[#allocation2 + $0x20] sm:$0xff] %v578_v38  ;;  %v257_v40 = vpop.f32.mrf.mxu1 }
  0xac   :  { %v258_v41 = vadd.f32 %v257_v40, %v141_v39 }
  0xae   :  { %v391_v42 = vpop.f32.mrf.mxu2  ;;  %v541_v44 = vpop.f32.mrf.mxu3 }
  0xaf   :  { %v429_v43 = vadd.f32 %v391_v42, %v258_v41 }
  0xb1   :  { %v579_v45 = vadd.f32 %v541_v44, %v429_v43 }
  0xb2   :  { %v144_v46 = vpop.f32.mrf.mxu0 }
  0xb3   :  { %595 = vst [vmem:[#allocation2 + $0x28] sm:$0xff] %v579_v45  ;;  %v260_v47 = vpop.f32.mrf.mxu1 }
  0xb4   :  { %v261_v48 = vadd.f32 %v260_v47, %v144_v46 }
  0xb6   :  { %v394_v49 = vpop.f32.mrf.mxu2  ;;  %v544_v51 = vpop.f32.mrf.mxu3 }
  0xb7   :  { %v430_v50 = vadd.f32 %v394_v49, %v261_v48 }
  0xb9   :  { %v580_v52 = vadd.f32 %v544_v51, %v430_v50 }
  0xba   :  { %v147_v53 = vpop.f32.mrf.mxu0 }
  0xbb   :  { %596 = vst [vmem:[#allocation2 + $0x30] sm:$0xff] %v580_v52  ;;  %v263_v54 = vpop.f32.mrf.mxu1 }
  0xbc   :  { %v264_v55 = vadd.f32 %v263_v54, %v147_v53 }
  0xbe   :  { %v397_v56 = vpop.f32.mrf.mxu2  ;;  %v547_v58 = vpop.f32.mrf.mxu3 }
  0xbf   :  { %v431_v57 = vadd.f32 %v397_v56, %v264_v55 }
  0xc1   :  { %v581_v59 = vadd.f32 %v547_v58, %v431_v57 }
  0xc2   :  { %v150_v60 = vpop.f32.mrf.mxu0 }
  0xc3   :  { %597 = vst [vmem:[#allocation2 + $0x38] sm:$0xff] %v581_v59  ;;  %v266_v61 = vpop.f32.mrf.mxu1 }
  0xc4   :  { %v267_v62 = vadd.f32 %v266_v61, %v150_v60 }
  0xc6   :  { %v400_v63 = vpop.f32.mrf.mxu2  ;;  %v550_v1 = vpop.f32.mrf.mxu3 }
  0xc7   :  { %v432_v0 = vadd.f32 %v400_v63, %v267_v62 }
  0xc9   :  { %v582_v2 = vadd.f32 %v550_v1, %v432_v0 }
  0xca   :  { %v153_v3 = vpop.f32.mrf.mxu0 }
  0xcb   :  { %598 = vst [vmem:[#allocation2 + $0x40] sm:$0xff] %v582_v2  ;;  %v269_v4 = vpop.f32.mrf.mxu1 }
  0xcc   :  { %v270_v5 = vadd.f32 %v269_v4, %v153_v3 }
  0xce   :  { %v403_v6 = vpop.f32.mrf.mxu2  ;;  %v553_v8 = vpop.f32.mrf.mxu3 }
  0xcf   :  { %v433_v7 = vadd.f32 %v403_v6, %v270_v5 }
  0xd1   :  { %v583_v9 = vadd.f32 %v553_v8, %v433_v7 }
  0xd2   :  { %v156_v10 = vpop.f32.mrf.mxu0 }
  0xd3   :  { %599 = vst [vmem:[#allocation2 + $0x48] sm:$0xff] %v583_v9  ;;  %v272_v11 = vpop.f32.mrf.mxu1 }
  0xd4   :  { %v273_v12 = vadd.f32 %v272_v11, %v156_v10 }
  0xd6   :  { %v406_v13 = vpop.f32.mrf.mxu2  ;;  %v556_v15 = vpop.f32.mrf.mxu3 }
  0xd7   :  { %v434_v14 = vadd.f32 %v406_v13, %v273_v12 }
  0xd9   :  { %v584_v16 = vadd.f32 %v556_v15, %v434_v14 }
  0xda   :  { %v159_v17 = vpop.f32.mrf.mxu0 }
  0xdb   :  { %600 = vst [vmem:[#allocation2 + $0x50] sm:$0xff] %v584_v16  ;;  %v275_v18 = vpop.f32.mrf.mxu1 }
  0xdc   :  { %v276_v19 = vadd.f32 %v275_v18, %v159_v17 }
  0xde   :  { %v409_v20 = vpop.f32.mrf.mxu2  ;;  %v559_v22 = vpop.f32.mrf.mxu3 }
  0xdf   :  { %v435_v21 = vadd.f32 %v409_v20, %v276_v19 }
  0xe1   :  { %v585_v23 = vadd.f32 %v559_v22, %v435_v21 }
  0xe2   :  { %v162_v24 = vpop.f32.mrf.mxu0 }
  0xe3   :  { %601 = vst [vmem:[#allocation2 + $0x58] sm:$0xff] %v585_v23  ;;  %v278_v25 = vpop.f32.mrf.mxu1 }
  0xe4   :  { %v279_v26 = vadd.f32 %v278_v25, %v162_v24 }
  0xe6   :  { %v412_v27 = vpop.f32.mrf.mxu2  ;;  %v562_v29 = vpop.f32.mrf.mxu3 }
  0xe7   :  { %v436_v28 = vadd.f32 %v412_v27, %v279_v26 }
  0xe9   :  { %v586_v30 = vadd.f32 %v562_v29, %v436_v28 }
  0xea   :  { %v165_v31 = vpop.f32.mrf.mxu0 }
  0xeb   :  { %602 = vst [vmem:[#allocation2 + $0x60] sm:$0xff] %v586_v30  ;;  %v281_v32 = vpop.f32.mrf.mxu1 }
  0xec   :  { %v282_v33 = vadd.f32 %v281_v32, %v165_v31 }
  0xee   :  { %v415_v34 = vpop.f32.mrf.mxu2  ;;  %v565_v36 = vpop.f32.mrf.mxu3 }
  0xef   :  { %v437_v35 = vadd.f32 %v415_v34, %v282_v33 }
  0xf1   :  { %v587_v37 = vadd.f32 %v565_v36, %v437_v35 }
  0xf2   :  { %v168_v38 = vpop.f32.mrf.mxu0 }
  0xf3   :  { %603 = vst [vmem:[#allocation2 + $0x68] sm:$0xff] %v587_v37  ;;  %v284_v39 = vpop.f32.mrf.mxu1 }
  0xf4   :  { %v285_v40 = vadd.f32 %v284_v39, %v168_v38 }
  0xf6   :  { %v418_v41 = vpop.f32.mrf.mxu2  ;;  %v568_v43 = vpop.f32.mrf.mxu3 }
  0xf7   :  { %v438_v42 = vadd.f32 %v418_v41, %v285_v40 }
  0xf9   :  { %v588_v44 = vadd.f32 %v568_v43, %v438_v42 }
  0xfa   :  { %v171_v45 = vpop.f32.mrf.mxu0 }
  0xfb   :  { %604 = vst [vmem:[#allocation2 + $0x70] sm:$0xff] %v588_v44  ;;  %v287_v46 = vpop.f32.mrf.mxu1 }
  0xfc   :  { %v288_v47 = vadd.f32 %v287_v46, %v171_v45 }
  0xfe   :  { %v421_v48 = vpop.f32.mrf.mxu2  ;;  %v571_v50 = vpop.f32.mrf.mxu3 }
  0xff   :  { %v439_v49 = vadd.f32 %v421_v48, %v288_v47 }
 0x101   :  { %v589_v51 = vadd.f32 %v571_v50, %v439_v49 }
 0x103   :  { %605 = vst [vmem:[#allocation2 + $0x78] sm:$0xff] %v589_v51 }
 0x104   :  { %618 = dma.vmem_to_hbm [thread:$0]  %s611_s1, 2048, %s613_s24, [#allocation3], %s725_s25, %s725_s25, %s726_s26  }
 0x105   :  { %722 = dma.done.wait [#allocation3], 2048  }
 0x106   :  { %723 = vsyncadd [#allocation3], 4294965248 }
 0x107   :  { %623 = vsyncpa [#allocation3], 1 }

</bundles_post_ra>
